<compile_context>
chip_gen: v5e
topology: v5e:2x2
jax: 0.10.0
libtpu: 0.0.40
codegen_flags: <defaults>
</compile_context>

<pallas_src>
import functools
import math

import jax
import jax.numpy as jnp
from jax.experimental import pallas as pl
from jax.experimental.pallas import tpu as pltpu


_TM = 256                                    # max row tile over flattened batch*points
_PARALLEL = pltpu.CompilerParams(dimension_semantics=("parallel",))


def _default_vmem_limit():
    try:
        cap = int(pltpu.get_tpu_info().vmem_capacity_bytes)
    except Exception:
        cap = 64 << 20
    # leave headroom below physical VMEM; never below the default scoped limit.
    return max(32 << 20, min(int(cap * 3 // 4), 96 << 20))


_MHA_VMEM_LIMIT = _default_vmem_limit()
_MHA_PARAMS = pltpu.CompilerParams(dimension_semantics=("parallel",),
                                   vmem_limit_bytes=_MHA_VMEM_LIMIT)


def _pick_tm(rows, cap=_TM):
    # Largest tile that still gives a grid of >= 2 (so both v7x TCs get work);
    # tiny levels fall back to a rounded half-split.
    for tm in (256, 128, 64):
        if tm <= cap and rows >= 2 * tm:
            return tm
    return int(max(8, min(cap, ((rows + 15) // 16) * 8)))


def _mha_tm(rows, k, e):
    # Bound the ~6 f32 (tm, k, e)-sized intermediates to ~24 MiB total so the MHA
    # working set fits v7x's 64 MiB VMEM with double-buffering headroom
    # (TM=128 at the real E=256, K=32 config; TM<=256 otherwise).
    cap = (24 << 20) // max(1, 6 * k * e * 4)
    cap = max(64, min(_TM, (cap // 64) * 64))
    return _pick_tm(rows, cap)


def _pad_rows(a, tm):
    r = a.shape[0]
    rp = pl.cdiv(r, tm) * tm
    if rp != r:
        a = jnp.pad(a, [(0, rp - r)] + [(0, 0)] * (a.ndim - 1))
    return a, r


# ----------------------------------------------------------------------------- kernels

def _linear_kernel(x_ref, w_ref, b_ref, o_ref):
    x = x_ref[...].astype(jnp.bfloat16)
    o_ref[...] = (jnp.dot(x, w_ref[...], preferred_element_type=jnp.float32)
                  + b_ref[...]).astype(o_ref.dtype)


def _ff_residual_kernel(x_ref, w1_ref, b1_ref, w2_ref, b2_ref, o_ref):
    # Residual(FeedForward): x + W2 gelu(W1 x + b1) + b2   (dropout inactive, eval)
    # TODO(synk): FeedForward internals are not in the spec; Linear-GELU-Linear assumed.
    x = x_ref[...]                                                    # bf16
    h = jnp.dot(x, w1_ref[...], preferred_element_type=jnp.float32) + b1_ref[...]
    h = jax.nn.gelu(h, approximate=True)
    y = jnp.dot(h.astype(jnp.bfloat16), w2_ref[...],
                preferred_element_type=jnp.float32) + b2_ref[...]
    o_ref[...] = (x.astype(jnp.float32) + y).astype(o_ref.dtype)


def _mha_knn_kernel(q_ref, kv_ref, wq_ref, bq_ref, wkv_ref, bkv_ref,
                    wo_ref, bo_ref, hmask_ref, hmask_t_ref,
                    o_ref, w_ref, *, num_heads):
    # Per-point multi-head attention: query = the point itself, key/value = its K
    # gathered nearest neighbors (nn.MultiheadAttention semantics, eval mode).
    tm, k, e = kv_ref.shape
    hd = e // num_heads
    kpad = w_ref.shape[1]

    q_b = q_ref[...]                                                  # (TM, E) bf16
    kv2d_b = kv_ref[...].reshape(tm * k, e)                           # (TM*K, E) bf16

    # 1/sqrt(hd) already folded into wq/bq in the wrapper.
    qp = jnp.dot(q_b, wq_ref[...],
                 preferred_element_type=jnp.float32) + bq_ref[...]    # (TM, E)
    # Fused K|V projection: one (TM*K,E)x(E,2E) matmul, split on the lane axis.
    kvp = jnp.dot(kv2d_b, wkv_ref[...],
                  preferred_element_type=jnp.float32) + bkv_ref[...]  # (TM*K, 2E)
    kp = kvp[:, :e].reshape(tm, k, e)
    vp = kvp[:, e:].reshape(tm, k, e)

    # Per-head q.k as an elementwise product followed by a head-membership
    # reduction -> no per-head lane slicing, E stays on the lane axis.
    prod = qp[:, None, :] * kp                                        # (TM, K, E)
    if hd == 1:
        # num_heads == embed_dim (real config): head mask is the identity; skip it.
        sc = prod                                                     # (TM, K, H)
    else:
        sc = jnp.dot(prod.reshape(tm * k, e).astype(jnp.bfloat16), hmask_ref[...],
                     preferred_element_type=jnp.float32).reshape(tm, k, num_heads)

    mx = jnp.max(sc, axis=1, keepdims=True)                           # (TM, 1, H)
    p = jnp.exp(sc - mx)
    denom = jnp.sum(p, axis=1, keepdims=True)
    p = p * pl.reciprocal(denom, approx=False)                        # softmax over K

    # Head-averaged attention weights (PyTorch average_attn_weights=True default),
    # padded K -> kpad (>=128) via a one-hot padding matmul so the store is lane-dense.
    wsum = jnp.sum(p, axis=-1) * (1.0 / num_heads)                    # (TM, K)
    pad_eye = (jax.lax.broadcasted_iota(jnp.int32, (k, kpad), 0) ==
               jax.lax.broadcasted_iota(jnp.int32, (k, kpad), 1)).astype(jnp.float32)
    w_ref[...] = jnp.dot(wsum, pad_eye,
                         preferred_element_type=jnp.float32).astype(w_ref.dtype)

    # Expand per-head probs back onto E lanes, combine values, output projection.
    if hd == 1:
        pe = p                                                        # (TM, K, E)
    else:
        pe = jnp.dot(p.reshape(tm * k, num_heads).astype(jnp.bfloat16),
                     hmask_t_ref[...],
                     preferred_element_type=jnp.float32).reshape(tm, k, e)
    ctx = jnp.sum(pe * vp, axis=1)                                    # (TM, E)
    o_ref[...] = (jnp.dot(ctx.astype(jnp.bfloat16), wo_ref[...],
                          preferred_element_type=jnp.float32)
                  + bo_ref[...]).astype(o_ref.dtype)


# ----------------------------------------------------------------------------- wrappers

def pallas_linear(x2d, w, b, out_dtype=jnp.bfloat16, tm=None):
    rows = x2d.shape[0]
    if tm is None:
        tm = _pick_tm(rows)
    xp, r = _pad_rows(x2d, tm)
    rp, din = xp.shape
    dout = w.shape[1]
    out = pl.pallas_call(
        _linear_kernel,
        out_shape=jax.ShapeDtypeStruct((rp, dout), out_dtype),
        grid=(rp // tm,),
        in_specs=[pl.BlockSpec((tm, din), lambda i: (i, 0)),
                  pl.BlockSpec((din, dout), lambda i: (0, 0)),
                  pl.BlockSpec((1, dout), lambda i: (0, 0))],
        out_specs=pl.BlockSpec((tm, dout), lambda i: (i, 0)),
        compiler_params=_PARALLEL,
    )(xp, w.astype(jnp.bfloat16), b.astype(jnp.float32))
    return out[:r]


def pallas_ff_residual(x2d, w1, b1, w2, b2, tm=None):
    rows, e = x2d.shape
    hdim = w1.shape[1]
    hp = pl.cdiv(hdim, 128) * 128
    if hp != hdim:
        # Zero-padding the hidden dim is numerically exact and makes the GELU
        # intermediate lane-dense (full 128-wide MXU output).
        w1 = jnp.pad(w1, ((0, 0), (0, hp - hdim)))
        b1 = jnp.pad(b1, ((0, 0), (0, hp - hdim)))
        w2 = jnp.pad(w2, ((0, hp - hdim), (0, 0)))
    if tm is None:
        tm = _pick_tm(rows)
    xp, r = _pad_rows(x2d.astype(jnp.bfloat16), tm)
    rp = xp.shape[0]
    out = pl.pallas_call(
        _ff_residual_kernel,
        out_shape=jax.ShapeDtypeStruct((rp, e), jnp.bfloat16),
        grid=(rp // tm,),
        in_specs=[pl.BlockSpec((tm, e), lambda i: (i, 0)),
                  pl.BlockSpec((e, hp), lambda i: (0, 0)),
                  pl.BlockSpec((1, hp), lambda i: (0, 0)),
                  pl.BlockSpec((hp, e), lambda i: (0, 0)),
                  pl.BlockSpec((1, e), lambda i: (0, 0))],
        out_specs=pl.BlockSpec((tm, e), lambda i: (i, 0)),
        compiler_params=_PARALLEL,
    )(xp, w1.astype(jnp.bfloat16), b1.astype(jnp.float32),
      w2.astype(jnp.bfloat16), b2.astype(jnp.float32))
    return out[:r]


def pallas_mha_knn(q2d, kv3d, wqkv, bqkv, wo, bo, num_heads, tm=None):
    rows, e = q2d.shape
    k = kv3d.shape[1]
    assert e % num_heads == 0, "embed_dim must be divisible by num_heads"
    hd = e // num_heads
    if tm is None:
        tm = _mha_tm(rows, k, e)

    qp_, r = _pad_rows(q2d.astype(jnp.bfloat16), tm)
    kvp, _ = _pad_rows(kv3d.astype(jnp.bfloat16), tm)
    rp = qp_.shape[0]
    kpad = pl.cdiv(k, 128) * 128

    scale = 1.0 / math.sqrt(hd)
    wq = (wqkv[:, :e] * scale).astype(jnp.bfloat16)     # scale folded into q proj
    bq = (bqkv[:, :e] * scale).astype(jnp.float32)
    wkv = wqkv[:, e:].astype(jnp.bfloat16)              # fused [K|V] projection
    bkv = bqkv[:, e:].astype(jnp.float32)
    hmask = (jnp.arange(e)[:, None] // hd
             == jnp.arange(num_heads)[None, :]).astype(jnp.bfloat16)  # (E, H)
    hmask_t = hmask.T                                                 # (H, E)

    kernel = functools.partial(_mha_knn_kernel, num_heads=num_heads)
    out, attw = pl.pallas_call(
        kernel,
        out_shape=(jax.ShapeDtypeStruct((rp, e), jnp.bfloat16),
                   jax.ShapeDtypeStruct((rp, kpad), jnp.float32)),
        grid=(rp // tm,),
        in_specs=[pl.BlockSpec((tm, e), lambda i: (i, 0)),
                  pl.BlockSpec((tm, k, e), lambda i: (i, 0, 0)),
                  pl.BlockSpec((e, e), lambda i: (0, 0)),
                  pl.BlockSpec((1, e), lambda i: (0, 0)),
                  pl.BlockSpec((e, 2 * e), lambda i: (0, 0)),
                  pl.BlockSpec((1, 2 * e), lambda i: (0, 0)),
                  pl.BlockSpec((e, e), lambda i: (0, 0)),
                  pl.BlockSpec((1, e), lambda i: (0, 0)),
                  pl.BlockSpec((e, num_heads), lambda i: (0, 0)),
                  pl.BlockSpec((num_heads, e), lambda i: (0, 0))],
        out_specs=(pl.BlockSpec((tm, e), lambda i: (i, 0)),
                   pl.BlockSpec((tm, kpad), lambda i: (i, 0))),
        compiler_params=_MHA_PARAMS,
    )(qp_, kvp, wq, bq, wkv, bkv,
      wo.astype(jnp.bfloat16), bo.astype(jnp.float32), hmask, hmask_t)
    return out[:r], attw[:r, :k]


# ----------------------------------------------------------------------------- glue

def knn_indices(h, K):
    # TODO(synk): replaces pytorch3d.ops.knn_points(x, x, K) -- brute-force pairwise
    #             distance top-k in feature space (self included, sorted ascending).
    #             At the real V~41k this must be tiled with a running top-K.
    hf = h.astype(jnp.float32)
    n2 = jnp.sum(hf * hf, axis=-1)
    d2 = (n2[:, :, None] + n2[:, None, :]
          - 2.0 * jnp.einsum('bme,bne->bmn', hf, hf,
                             precision=jax.lax.Precision.HIGHEST))
    _, idx = jax.lax.top_k(-d2, K)
    return idx                                                        # (B, V, K)


def _gather_rows(h, idx):
    # h: (B, V, E), idx: (B, ...) integer point indices -> (B, ..., E)
    return jax.vmap(lambda hb, ib: hb[ib])(h, idx)


# ----------------------------------------------------------------------------- forward

def mha_encoder_forward(x, params, sample_key, cfg):
    B, N0, Din = x.shape
    E, H, K = cfg['embed_dim'], cfg['num_heads'], cfg['K']
    levels = cfg['sample_levels']

    h = pallas_linear(x.reshape(B * N0, Din), params['emb_w'], params['emb_b'],
                      out_dtype=jnp.bfloat16).reshape(B, N0, E)       # bf16 between levels

    weights = jnp.zeros((B, N0), jnp.float32)
    idx = jnp.broadcast_to(jnp.arange(N0, dtype=jnp.int32)[None, :], (B, N0))
    indices = []
    batch_ix = jnp.arange(B)[:, None]
    skeys = jax.random.split(sample_key, len(levels))
    aux = {'knn_idx': [], 'sample_idx': []}

    for i, sl in enumerate(levels):
        if i > 0:
            # torch.randint analog: sample sl points (with replacement), remap idx.
            x_i = jax.random.randint(skeys[i], (B, sl), 0, h.shape[1], dtype=jnp.int32)
            h = _gather_rows(h, x_i)
            idx = x_i
            for idx_prev in reversed(indices):
                idx = jax.vmap(lambda a, j: a[j])(idx_prev, idx)
            indices.append(x_i)
            aux['sample_idx'].append(x_i)

        V = h.shape[1]
        knn_idx = knn_indices(h, K)                                   # (B, V, K)
        aux['knn_idx'].append(knn_idx)
        kv = _gather_rows(h, knn_idx)                                 # (B, V, K, E) bf16

        m = params[f'mha_{i}']
        h2d, attw2d = pallas_mha_knn(h.reshape(B * V, E), kv.reshape(B * V, K, E),
                                     m['wqkv'], m['bqkv'], m['wo'], m['bo'], H)
        h = h2d.reshape(B, V, E)
        attw = attw2d.reshape(B, V, K)

        # TODO(synk): MHA_KNN(return_weights=True) internals not in the spec; x_w is
        #             taken as the attention mass each point receives as a neighbor
        #             (scatter-add of head-averaged attention weights).
        x_w = jnp.zeros((B, V), jnp.float32)
        x_w = x_w.at[batch_ix, knn_idx.reshape(B, V * K)].add(attw.reshape(B, V * K))

        f = params[f'ff_{i}']
        h = pallas_ff_residual(h.reshape(B * V, E),
                               f['w1'], f['b1'], f['w2'], f['b2']).reshape(B, V, E)

        weights = weights.at[batch_ix, idx].add(x_w)

    V = h.shape[1]
    out = pallas_linear(h.reshape(B * V, E), params['out_w'], params['out_b'],
                        out_dtype=jnp.float32).reshape(B, V, -1)
    return out, weights, aux


# ----------------------------------------------------------------------------- reference (pure jnp)

def _bdot(a, b):
    return jnp.dot(a.astype(jnp.bfloat16), b.astype(jnp.bfloat16),
                   preferred_element_type=jnp.float32)


def _ref_mha(h, kv, m, num_heads):
    B, V, E = h.shape
    K = kv.shape[2]
    hd = E // num_heads
    wq, wk, wv = m['wqkv'][:, :E], m['wqkv'][:, E:2 * E], m['wqkv'][:, 2 * E:]
    bq, bk, bv = m['bqkv'][:, :E], m['bqkv'][:, E:2 * E], m['bqkv'][:, 2 * E:]
    qp = (_bdot(h.reshape(-1, E), wq) + bq).reshape(B, V, E)
    kp = (_bdot(kv.reshape(-1, E), wk) + bk).reshape(B, V, K, E)
    vp = (_bdot(kv.reshape(-1, E), wv) + bv).reshape(B, V, K, E)
    qh = qp.reshape(B, V, num_heads, hd)
    kh = kp.reshape(B, V, K, num_heads, hd)
    vh = vp.reshape(B, V, K, num_heads, hd)
    sc = jnp.einsum('bvhd,bvkhd->bvhk', qh, kh,
                    precision=jax.lax.Precision.HIGHEST) / math.sqrt(hd)
    p = jax.nn.softmax(sc, axis=-1)
    attw = jnp.mean(p, axis=2)                                        # (B, V, K)
    ctx = jnp.einsum('bvhk,bvkhd->bvhd', p, vh,
                     precision=jax.lax.Precision.HIGHEST).reshape(B, V, E)
    out = (_bdot(ctx.reshape(-1, E), m['wo']) + m['bo']).reshape(B, V, E)
    return out, attw


def reference_forward(x, params, cfg, aux):
    # Reuses the kernel path's KNN / sampling index tables (identical glue code) so
    # the comparison validates the numerical kernels, not top-k tie-breaking.
    # Activations are rounded to bf16 at the same stage boundaries as the kernel path.
    B, N0, Din = x.shape
    E, H, K = cfg['embed_dim'], cfg['num_heads'], cfg['K']
    levels = cfg['sample_levels']

    h = ((_bdot(x.reshape(-1, Din), params['emb_w']) + params['emb_b'])
         .astype(jnp.bfloat16).reshape(B, N0, E))
    weights = jnp.zeros((B, N0), jnp.float32)
    idx = jnp.broadcast_to(jnp.arange(N0, dtype=jnp.int32)[None, :], (B, N0))
    indices = []
    batch_ix = jnp.arange(B)[:, None]

    for i, sl in enumerate(levels):
        if i > 0:
            x_i = aux['sample_idx'][i - 1]
            h = _gather_rows(h, x_i)
            idx = x_i
            for idx_prev in reversed(indices):
                idx = jax.vmap(lambda a, j: a[j])(idx_prev, idx)
            indices.append(x_i)

        V = h.shape[1]
        knn_idx = aux['knn_idx'][i]
        kv = _gather_rows(h, knn_idx)
        m = params[f'mha_{i}']
        h, attw = _ref_mha(h, kv, m, H)
        h = h.astype(jnp.bfloat16)

        x_w = jnp.zeros((B, V), jnp.float32)
        x_w = x_w.at[batch_ix, knn_idx.reshape(B, V * K)].add(attw.reshape(B, V * K))

        f = params[f'ff_{i}']
        hf = jax.nn.gelu(_bdot(h.reshape(-1, E), f['w1']) + f['b1'], approximate=True)
        h = (h.astype(jnp.float32)
             + (_bdot(hf, f['w2']) + f['b2']).reshape(B, V, E)).astype(jnp.bfloat16)

        weights = weights.at[batch_ix, idx].add(x_w)

    V = h.shape[1]
    out = (_bdot(h.reshape(-1, E), params['out_w'])
           + params['out_b']).reshape(B, V, -1)
    return out, weights


# ----------------------------------------------------------------------------- init & main

def _init_linear(key, din, dout):
    kw, kb = jax.random.split(key)
    s = 1.0 / math.sqrt(din)
    w = jax.random.uniform(kw, (din, dout), jnp.float32, -s, s)
    b = jax.random.uniform(kb, (1, dout), jnp.float32, -s, s)
    return w, b


def _build_params(key, cfg):
    keys = iter(jax.random.split(key, 4 * len(cfg['sample_levels']) + 4))
    params = {}
    params['emb_w'], params['emb_b'] = _init_linear(next(keys), cfg['input_dim'],
                                                    cfg['embed_dim'])
    for i in range(len(cfg['sample_levels'])):
        wqkv, bqkv = _init_linear(next(keys), cfg['embed_dim'], 3 * cfg['embed_dim'])
        wo, bo = _init_linear(next(keys), cfg['embed_dim'], cfg['embed_dim'])
        params[f'mha_{i}'] = dict(wqkv=wqkv, bqkv=bqkv, wo=wo, bo=bo)
        w1, b1 = _init_linear(next(keys), cfg['embed_dim'], cfg['hidden_dim'])
        w2, b2 = _init_linear(next(keys), cfg['hidden_dim'], cfg['embed_dim'])
        params[f'ff_{i}'] = dict(w1=w1, b1=b1, w2=w2, b2=b2)
    params['out_w'], params['out_b'] = _init_linear(next(keys), cfg['embed_dim'],
                                                    cfg['output_dim'])
    return params


if __name__ == "__main__":
    root = jax.random.PRNGKey(0)
    B = 2

    # Small analogs of MHAEncoder(input_dim=3, embed_dim=256, hidden_dim=64,
    # num_heads=256, K=32, output_dim=256, sample_levels=[40962,...,162]).
    configs = [
        # head_dim > 1 path (exercises the bf16 head-mask matmuls)
        dict(input_dim=3, embed_dim=128, hidden_dim=64, num_heads=8, K=8,
             output_dim=128, sample_levels=[64, 32, 16]),
        # head_dim == 1 path (analog of the real num_heads == embed_dim config)
        dict(input_dim=3, embed_dim=128, hidden_dim=64, num_heads=128, K=8,
             output_dim=128, sample_levels=[32, 16]),
    ]

    for ci, cfg in enumerate(configs):
        kp, kx, ks = jax.random.split(jax.random.fold_in(root, ci), 3)
        params = _build_params(kp, cfg)
        x = jax.random.normal(kx, (B, cfg['sample_levels'][0], cfg['input_dim']),
                              jnp.float32)

        out, weights, aux = mha_encoder_forward(x, params, ks, cfg)
        out = jax.block_until_ready(out)
        weights = jax.block_until_ready(weights)

        ref_out, ref_w = reference_forward(x, params, cfg, aux)

        assert out.shape == (B, cfg['sample_levels'][-1], cfg['output_dim'])
        assert weights.shape == (B, cfg['sample_levels'][0])
        # Tolerance reflects intentional bf16 rounding inside the head-mask matmuls.
        assert bool(jnp.allclose(out, ref_out, atol=5e-2, rtol=5e-2)), \
            f"cfg {ci}: output mismatch (max abs err {jnp.max(jnp.abs(out - ref_out))})"
        assert bool(jnp.allclose(weights, ref_w, atol=5e-2, rtol=5e-2)), \
            f"cfg {ci}: weights mismatch (max abs err {jnp.max(jnp.abs(weights - ref_w))})"

    print("KERNEL_OK")
</pallas_src>

<mosaic_0001>
module attributes {stable_mosaic.version = 11 : i64} {
  func.func @_linear_kernel(%arg0: i32, %arg1: memref<64x3xf32, #tpu.memory_space<vmem>>, %arg2: memref<3x128xbf16, #tpu.memory_space<vmem>>, %arg3: memref<1x128xf32, #tpu.memory_space<vmem>>, %arg4: memref<64x128xbf16, #tpu.memory_space<vmem>>) attributes {dimension_semantics = [#tpu.dimension_semantics<parallel>], iteration_bounds = array<i64: 2>, scalar_prefetch = 0 : i64, scratch_operands = 0 : i64, tpu.core_type = #tpu.core_type<tc>, window_params = [{transform_indices = @transform_0, window_bounds = array<i64: 64, 3>}, {pipeline_mode = #tpu.pipeline_mode<synchronous>, transform_indices = @transform_1, window_bounds = array<i64: 3, 128>}, {pipeline_mode = #tpu.pipeline_mode<synchronous>, transform_indices = @transform_2, window_bounds = array<i64: 1, 128>}, {transform_indices = @transform_3, window_bounds = array<i64: 64, 128>}]} {
    %c0 = arith.constant 0 : index
    %c0_0 = arith.constant 0 : index
    %0 = vector.load %arg1[%c0, %c0_0] : memref<64x3xf32, #tpu.memory_space<vmem>>, vector<64x3xf32>
    %1 = arith.truncf %0 : vector<64x3xf32> to vector<64x3xbf16>
    %c0_1 = arith.constant 0 : index
    %c0_2 = arith.constant 0 : index
    %2 = vector.load %arg2[%c0_1, %c0_2] : memref<3x128xbf16, #tpu.memory_space<vmem>>, vector<3x128xbf16>
    %cst = arith.constant dense<0.000000e+00> : vector<64x128xf32>
    %3 = tpu.matmul %1, %2, %cst {dimension_numbers = #tpu.dot_dimension_numbers<[1], [0], [0], [1], [0, 0, 1, 1], [], []>} : vector<64x3xbf16>, vector<3x128xbf16>, vector<64x128xf32> -> vector<64x128xf32>
    %c0_3 = arith.constant 0 : index
    %c0_4 = arith.constant 0 : index
    %4 = vector.load %arg3[%c0_3, %c0_4] : memref<1x128xf32, #tpu.memory_space<vmem>>, vector<1x128xf32>
    %5 = vector.broadcast %4 : vector<1x128xf32> to vector<64x128xf32>
    %6 = arith.addf %3, %5 : vector<64x128xf32>
    %7 = arith.truncf %6 : vector<64x128xf32> to vector<64x128xbf16>
    %c0_5 = arith.constant 0 : index
    %c0_6 = arith.constant 0 : index
    %8 = vector.load %arg4[%c0_5, %c0_6] : memref<64x128xbf16, #tpu.memory_space<vmem>>, vector<64x128xbf16>
    tpu.vector_store %arg4[%c0_5, %c0_6], %7 {strides = array<i32>} : memref<64x128xbf16, #tpu.memory_space<vmem>>, vector<64x128xbf16>,
    return
  }
  func.func @transform_0(%arg0: i32) -> (i32, i32) {
    %c0_i32 = arith.constant 0 : i32
    %c0_i32_0 = arith.constant 0 : i32
    return %arg0, %c0_i32 : i32, i32
  }
  func.func @transform_1(%arg0: i32) -> (i32, i32) {
    %c0_i32 = arith.constant 0 : i32
    %c0_i32_0 = arith.constant 0 : i32
    %c0_i32_1 = arith.constant 0 : i32
    return %c0_i32, %c0_i32_0 : i32, i32
  }
  func.func @transform_2(%arg0: i32) -> (i32, i32) {
    %c0_i32 = arith.constant 0 : i32
    %c0_i32_0 = arith.constant 0 : i32
    %c0_i32_1 = arith.constant 0 : i32
    return %c0_i32, %c0_i32_0 : i32, i32
  }
  func.func @transform_3(%arg0: i32) -> (i32, i32) {
    %c0_i32 = arith.constant 0 : i32
    %c0_i32_0 = arith.constant 0 : i32
    return %arg0, %c0_i32 : i32, i32
  }
}

</mosaic_0001>

<bundles_post_ra>
// kernel: tpu_custom_call.1
= control target key start
LH: loop header
LB: loop body
LE: loop exit
PB: predicated region body
PF: predicated region fallthrough
CT: control target
= control target key end

     0   :  { %8 = vsyncpa [#allocation3], 0  ;;  %s600_s0 = inlined_call_operand.vmem [shape: f32[128,3], index: 0, kind: input, shape index: {}]   ;;  %s601_s1 = inlined_call_operand.vmem [shape: bf16[3,128], index: 1, kind: input, shape index: {}]   ;;  %s602_s2 = inlined_call_operand.vmem [shape: f32[1,128], index: 2, kind: input, shape index: {}]   ;;  %s603_s3 = inlined_call_operand.hbm [shape: bf16[128,128], index: 3, kind: output, shape index: {}]  }
   0x1   :  { %10 = vsyncpa [#allocation3 + $0x1], 0  ;;  %s506_s12 = smov 0   ;;  %s508_s13 = smov 0  }
   0x2   :  { %s510_s14 = smov 0   ;;  %s512_s15 = smov 0  }
   0x3 LB: > { %s527_s16 = sadd.s32 4294967295, %s481_s15   ;;  %s333_s17 = sadd.s32 4294967294, %s481_s15   ;;  %s481_s15 = sphi %s512_s15, %s609_s15   ;;  %s477_s14 = sphi %s510_s14, %s608_s14   ;;  %s473_s13 = sphi %s508_s13, %s607_s13   ;;  %s469_s12 = sphi %s506_s12, %s606_s12  }
   0x4   : > { %s531_s18 = sadd.s32 1, %s481_s15   ;;  %s91_s19 = sadd.s32 1, %s477_s14 }
   0x5   : > { %s88_s20 = ssub.s32 %s481_s15, %s531_s18  ;;  %p101_p0 = scmp.ne.s32.totalorder %s477_s14, %s473_s13 }
   0x6   : > { %p89_p1 = scmp.eq.s32.totalorder %s88_s20, 0  ;;  %p102_p2 = scmp.eq.s32.totalorder %s527_s16, 1 }
   0x7   : > { %p107_p3 = scmp.ne.s32.totalorder %s473_s13, %s469_s12  ;;  %p108_p4 = scmp.eq.s32.totalorder %s333_s17, 1 }
   0x8   : > { %s542_s21 = scalar_select %p89_p1, %s477_s14, %s91_s19  }
   0x9   : > { %p544_p5 = por %p102_p2, %p101_p0  ;;  %p548_p6 = por %p108_p4, %p107_p3 }
   0xa   : > { %p336_p7 = scmp.ge.s32.totalorder %s481_s15, 1  ;;  %p141_p8 = scmp.lt.s32.totalorder %s481_s15, 3 }
   0xc   : > { %p142_p9 = pnand %p336_p7, %p141_p8 }
   0xd   : > { %s338_s26 = sshll.u32 (!%p142_p9), %s527_s16, 3  ;;  %s162_s4 = sand.u32 (!%p142_p9), 1, %s473_s13  }
   0xe   : > { %145 = sbr.rel (%p142_p9) target bundleno = 177 (0xb1), region = 32  ;;  %p166_p10 = scmp.lt.s32.totalorder (!%p142_p9), %s338_s26, 15 }
   0xf   : > { %s337_s7 = sshll.u32 (!%p142_p9), %s162_s4, 5  ;;  %s349_s8 = sshll.u32 (!%p142_p9), %s527_s16, 5 }
  0x10   : > { %s267_s11 = scalar_lea.hbm (!%p142_p9), %s603_s3, %s349_s8  ;;  %s164_s17 = scalar_lea.vmem (!%p142_p9), [#allocation2], %s337_s7 }
  0x11   : > { %s268_s19 = sshll.u32 (!%p142_p9), %s164_s17, 4  ;;  %s270_s20 = sshll.u32 (!%p142_p9), %s267_s11, 4  ;;  %s269_s19 = int_to_ptr.vmem [resolvable:$true] %s268_s19  ;;  %s271_s20 = int_to_ptr.hbm [resolvable:$true] %s270_s20 }
  0x12   : > { %s256_s16 = scalar_lea.sflag (!%p142_p9), [#allocation3], %s162_s4  ;;  %s433_s24 = sshra.s32 (!%p142_p9), %s271_s20, 4  ;;  %s434_s24 = int_to_ptr.hbm [resolvable:$true] %s433_s24 }
  0x13   : > { %v185_v0 = vld [vmem:[%s601_s1] sm:$0x3]  ;;  %vm203_vm0 = vcmask 1040384   ;;  %vm204_vm1 = vcmask 1041408   ;;  %v483_v1 = vmov 65535   ;;  %s611_s26 = smov (!%p166_p10, %s338_s26), 15  ;;  %p440_p0 = scmp.lt.s32.totalorder %s434_s24, %s603_s3 }
  0x14   : > { %v205_v2 = vsel %vm203_vm0, 4294967295, %v483_v1  ;;  %s339_s27 = sshll.u32 %s611_s26, 3  ;;  %vm190_vm2 = vcmask 23552   ;;  %v418_v19 = vld [vmem:[%s602_s2] ss:$0 sm:$0xff]  ;;  %s435_s25 = scalar_lea.hbm %s434_s24, 32 }
  0x15   : > { %v206_v3 = vsel %vm204_vm1, %v205_v2, 0  ;;  %s169_s30 = scalar_lea.vmem %s600_s0, %s339_s27  ;;  %p436_p11 = scmp.ne.s32.totalorder %s434_s24, %s435_s25 }
  0x16   : > { %v208_v4 = vand.u32 %v206_v3, %v185_v0  ;;  %v173_v5 = vld [vmem:[%s169_s30] sm:$0xff]  ;;  %v174_v6 = vld [vmem:[%s169_s30 + $0x8] sm:$0xff]  ;;  %v175_v7 = vld [vmem:[%s169_s30 + $0x10] sm:$0xff]  ;;  %s439_s28 = scalar_lea.hbm %s603_s3, 64 }
  0x17   : > { %v181_v8 = vpack.c.bf16 %v174_v6, %v173_v5  ;;  %v176_v9 = vld [vmem:[%s169_s30 + $0x18] sm:$0xff]  ;;  %v177_v10 = vld [vmem:[%s169_s30 + $0x20] sm:$0xff]  ;;  %v178_v11 = vld [vmem:[%s169_s30 + $0x28] sm:$0xff]  ;;  %p437_p12 = pnand %p436_p11, %p544_p5  ;;  %p441_p1 = scmp.lt.s32.totalorder %s439_s28, %s435_s25 }
  0x18   : > { %217 = vmatpush.bf16.msra.mxu0 %v208_v4  ;;  %373 = vmatpush.bf16.msra.mxu1 %v208_v4  ;;  %v182_v12 = vpack.c.bf16 %v176_v9, %v175_v7  ;;  %v183_v13 = vpack.c.bf16 %v178_v11, %v177_v10  ;;  %v179_v14 = vld [vmem:[%s169_s30 + $0x30] sm:$0xff]  ;;  %v180_v15 = vld [vmem:[%s169_s30 + $0x38] sm:$0xff] }
  0x19   : > { %374 = vmatpush.bf16.msra.mxu2 %v208_v4  ;;  %375 = vmatpush.bf16.msra.mxu3 %v208_v4  ;;  %v184_v16 = vpack.c.bf16 %v180_v15, %v179_v14  ;;  %p438_p13 = pneg %p437_p12  ;;  %p442_p2 = por %p441_p1, %p440_p0 }
  0x1b   : > { %340 = vmatmul.msk.bf16.vlgmr.msra.gmra.mxu0 %vm190_vm2, %v181_v8  ;;  %341 = vmatmul.msk.bf16.vlgmr.msra.gmra.mxu1 %vm190_vm2, %v182_v12  ;;  %p443_p3 = pnand %p442_p2, %p438_p13 }
  0x1c   : > { %342 = vmatmul.msk.bf16.vlgmr.msra.gmra.mxu2 %vm190_vm2, %v183_v13  ;;  %343 = vmatmul.msk.bf16.vlgmr.msra.gmra.mxu3 %vm190_vm2, %v184_v16 }
  0x98   : > { %v219_v17 = vpop.f32.mrf.mxu0  ;;  %v224_v18 = vpop.f32.mrf.mxu1 }
  0x99   : > { %v220_v23 = vadd.f32 %v418_v19, %v219_v17  ;;  %v225_v26 = vadd.f32 %v418_v19, %v224_v18 }
  0x9f   : > { %v229_v20 = vpop.f32.mrf.mxu2  ;;  %v234_v21 = vpop.f32.mrf.mxu3 }
  0xa0   : > { %v221_v22 = vpop.f32.mrf.mxu0  ;;  %v226_v25 = vpop.f32.mrf.mxu1  ;;  %v230_v31 = vadd.f32 %v418_v19, %v229_v20  ;;  %v235_v34 = vadd.f32 %v418_v19, %v234_v21 }
  0xa1   : > { %v222_v24 = vadd.f32 %v418_v19, %v221_v22  ;;  %v227_v27 = vadd.f32 %v418_v19, %v226_v25 }
  0xa3   : > { %v353_v28 = vpack.c.bf16 %v222_v24, %v220_v23  ;;  %v358_v29 = vpack.c.bf16 %v227_v27, %v225_v26 }
  0xa5   : > { %354 = vst [vmem:[%s164_s17] sm:$0xff] %v353_v28  }
  0xa6   : > { %370 = vst [vmem:[%s164_s17 + $0x8] sm:$0xff] %v358_v29  }
  0xa7   : > { %v231_v30 = vpop.f32.mrf.mxu2  ;;  %v236_v33 = vpop.f32.mrf.mxu3 }
  0xa8   : > { %v232_v32 = vadd.f32 %v418_v19, %v231_v30  ;;  %v237_v35 = vadd.f32 %v418_v19, %v236_v33 }
  0xaa   : > { %v363_v36 = vpack.c.bf16 %v232_v32, %v230_v31  ;;  %v368_v37 = vpack.c.bf16 %v237_v35, %v235_v34 }
  0xac   : > { %371 = vst [vmem:[%s164_s17 + $0x10] sm:$0xff] %v363_v36  }
  0xad   : > { %372 = vst [vmem:[%s164_s17 + $0x18] sm:$0xff] %v368_v37  }
  0xae   : > { %446 = shalt.err (!%p443_p3)
}
  0xaf   : > { %s484_s4 = smov 64   ;;  %s485_s5 = smov 4  }
  0xb0   : > { %376 = dma.vmem_to_hbm [thread:$0]  (%p544_p5), %s269_s19, 512, %s271_s20, %s256_s16, %s484_s4, %s484_s4, %s485_s5  }
  0xb1 PF: > { %p382_p4 = scmp.ge.s32.totalorder %s481_s15, 2  ;;  %s285_s6 = sand.u32 1, %s469_s12  }
  0xb2   : > { %s286_s7 = scalar_lea.sflag [#allocation3], %s285_s6 }
  0xb3   : > { %p379_p7 = pnand %p382_p4, %p548_p6 }
  0xb5   : > { %p380_p8 = pneg %p379_p7 }
  0xb7   : > { %464 = dma.done.wait (%p380_p8), %s286_s7, 512  }
  0xb8   : > { %466 = vsyncadd (%p380_p8), %s286_s7, 4294966784  ;;  %p13_p9 = scmp.ge.s32.totalorder %s531_s18, 4   ;;  %s606_s12 = smov %s473_s13 }
  0xb9   : > { %s607_s13 = smov %s477_s14  ;;  %s608_s14 = smov %s542_s21 }
  0xba   : > { %s609_s15 = smov %s531_s18  ;;  %15 = sbr.rel (!%p13_p9) target bundleno = 3 (0x3), region = 67 }
  0xbf   :  { %292 = vsyncpa [#allocation3], 1 }
  0xc0   :  { %294 = vsyncpa [#allocation3 + $0x1], 1 }

</bundles_post_ra>
